<compile_context>
chip_gen: v5e
topology: v5e:2x2
jax: 0.10.0
libtpu: 0.0.40
codegen_flags: <defaults>
</compile_context>

<pallas_src>
import math

import jax
import jax.numpy as jnp
from jax.experimental import pallas as pl
from jax.experimental.pallas import tpu as pltpu


_LANE = 128
_VMEM_BUDGET = 40 * 1024 * 1024     # conservative: fits v7x's 64 MiB physical


def _round_up(x, m):
    return (x + m - 1) // m * m


def _pick_tm(batch):
    """Batch tile: sublane-aligned, large enough to keep the MXU busy but not
    so large that small batches pay for padding."""
    if batch >= 1024:
        return 256
    if batch > 128:
        return 128
    return _round_up(batch, 8)


def _vmem_limit(need_bytes):
    # Headroom over the computed footprint; never below the 32 MiB default
    # scoped ceiling, never above what comfortably fits v7x's 64 MiB VMEM.
    return int(min(max(need_bytes * 5 // 4, 32 * 1024 * 1024),
                   60 * 1024 * 1024))


# ----------------------------- Pallas kernels ------------------------------ #
def _svd_linear_resident_kernel(x_ref, us_ref, vkt_ref, b_ref, o_ref):
    """One batch tile; all weights VMEM-resident (constant blocks).

    x_ref:   (TM, n_in_p)    f32/bf16  batch tile
    us_ref:  (n_in_p, k_p)   bf16      U_k * S   (constant block)
    vkt_ref: (k_p, n_out_p)  bf16      V_k^T     (constant block)
    b_ref:   (1, n_out_p)    f32       bias      (constant block)
    o_ref:   (TM, n_out_p)   out dtype
    """
    t = jnp.dot(x_ref[...].astype(jnp.bfloat16), us_ref[...],
                preferred_element_type=jnp.float32)
    y = jnp.dot(t.astype(jnp.bfloat16), vkt_ref[...],
                preferred_element_type=jnp.float32)
    o_ref[...] = (y + b_ref[...]).astype(o_ref.dtype)


def _svd_linear_tiled_kernel(x_ref, us_ref, vkt_ref, b_ref, o_ref, t_ref):
    """(TM, TN) output tile; the n_out axis is innermost so the cached first
    matmul t = x_tile @ (U_k*S) (stored once per batch tile, already bf16) is
    reused for every output-column tile.
    """
    @pl.when(pl.program_id(1) == 0)
    def _():
        t_ref[...] = jnp.dot(
            x_ref[...].astype(jnp.bfloat16), us_ref[...],
            preferred_element_type=jnp.float32).astype(jnp.bfloat16)

    y = jnp.dot(t_ref[...], vkt_ref[...], preferred_element_type=jnp.float32)
    o_ref[...] = (y + b_ref[...]).astype(o_ref.dtype)


# --------------------- weight preparation (per update) --------------------- #
def prepare_svd_linear_weights(u_k, s, v_kt, bias=None):
    """Fold S into U_k, zero-pad to lane/MXU-aligned shapes, cast to bf16.

    Call once per WEIGHT UPDATE (not per forward): the returned arrays are
    exactly what the kernel streams from HBM.  Padding is exact: padded n_in
    columns of x hit zero rows of U_k*S, padded k columns hit zero rows of
    V_k^T, padded output columns/rows are cropped at the end.
    """
    n_in, k = u_k.shape
    k2, n_out = v_kt.shape
    assert k2 == k
    n_in_p = _round_up(n_in, _LANE)
    k_p = _round_up(k, _LANE)
    n_out_p = _round_up(n_out, _LANE)

    us = u_k.astype(jnp.float32) * s.reshape(1, k).astype(jnp.float32)
    us_p = jnp.zeros((n_in_p, k_p), jnp.bfloat16).at[:n_in, :k].set(
        us.astype(jnp.bfloat16))
    vkt_p = jnp.zeros((k_p, n_out_p), jnp.bfloat16).at[:k, :n_out].set(
        v_kt.astype(jnp.bfloat16))
    b_p = jnp.zeros((1, n_out_p), jnp.float32)
    if bias is not None:
        b_p = b_p.at[:, :n_out].set(bias.reshape(1, n_out).astype(jnp.float32))
    return dict(us=us_p, vkt=vkt_p, bias=b_p, n_in=n_in, k=k, n_out=n_out)


# ------------------------------- forward ----------------------------------- #
def svd_linear_pallas(x, weights, out_dtype=jnp.float32, mode=None):
    """y = ((x @ U_k) * S) @ V_k^T + bias with prepared (padded bf16) weights.

    mode: None (auto), "resident" (weights fully VMEM-resident, 1-D grid over
    batch tiles), or "tiled" (2-D grid over (batch, n_out) tiles).
    """
    us_p, vkt_p, b_p = weights["us"], weights["vkt"], weights["bias"]
    n_in, n_out = weights["n_in"], weights["n_out"]
    B, xin = x.shape
    assert xin == n_in
    n_in_p, k_p = us_p.shape
    n_out_p = vkt_p.shape[1]

    tm = _pick_tm(B)
    b_pad = _round_up(B, tm)

    # Pad x only when needed (pad + bf16 cast in one pass); if already aligned,
    # feed f32 straight through and cast the tile in-kernel (hides on the VPU).
    if (b_pad, n_in_p) == (B, n_in):
        x_in = x
    else:
        x_in = jnp.zeros((b_pad, n_in_p), jnp.bfloat16).at[:B, :n_in].set(
            x.astype(jnp.bfloat16))
    x_bytes = jnp.dtype(x_in.dtype).itemsize
    o_bytes = jnp.dtype(out_dtype).itemsize

    # VMEM footprint of the resident layout (double-buffered blocks; constant
    # weight blocks are DMA'd once but still allocate 2 buffers by default).
    resident_need = (2 * n_in_p * k_p * 2 + 2 * k_p * n_out_p * 2
                     + 2 * n_out_p * 4
                     + 2 * tm * n_in_p * x_bytes
                     + 2 * tm * n_out_p * o_bytes
                     + tm * k_p * 4 + tm * n_out_p * 4)   # in-kernel temporaries

    if mode is None:
        mode = "resident" if resident_need <= _VMEM_BUDGET else "tiled"

    if mode == "resident":
        grid = (b_pad // tm,)
        y_p = pl.pallas_call(
            _svd_linear_resident_kernel,
            out_shape=jax.ShapeDtypeStruct((b_pad, n_out_p), out_dtype),
            grid_spec=pltpu.PrefetchScalarGridSpec(
                num_scalar_prefetch=0,
                grid=grid,
                in_specs=[
                    # x tile: the only block that changes with the grid.
                    pl.BlockSpec((tm, n_in_p), lambda i: (i, 0)),
                    # U_k*S, V_k^T, bias: constant blocks, DMA'd once total.
                    pl.BlockSpec((n_in_p, k_p), lambda i: (0, 0)),
                    pl.BlockSpec((k_p, n_out_p), lambda i: (0, 0)),
                    pl.BlockSpec((1, n_out_p), lambda i: (0, 0)),
                ],
                out_specs=pl.BlockSpec((tm, n_out_p), lambda i: (i, 0)),
            ),
            compiler_params=pltpu.CompilerParams(
                dimension_semantics=("parallel",),
                vmem_limit_bytes=_vmem_limit(resident_need)),
        )(x_in, us_p, vkt_p, b_p)
    else:
        # 256-wide output tiles fill the 2x256x256 MXU on v6e/v7x.
        tn = 256 if n_out_p % 256 == 0 else _LANE
        tiled_need = (2 * tm * n_in_p * x_bytes + 2 * n_in_p * k_p * 2
                      + 2 * k_p * tn * 2 + 2 * tn * 4
                      + 2 * tm * tn * o_bytes
                      + tm * k_p * 2)                      # bf16 t scratch
        # TODO(synk): if the U_k*S block alone (2*n_in_p*k_p*2 B) exceeds the
        # VMEM budget (very large n_in*k), add a third "arbitrary" reduction
        # grid axis over n_in with pl.when init/finalize on an f32 accumulator.
        grid = (b_pad // tm, n_out_p // tn)   # n_out innermost -> scratch reuse
        y_p = pl.pallas_call(
            _svd_linear_tiled_kernel,
            out_shape=jax.ShapeDtypeStruct((b_pad, n_out_p), out_dtype),
            grid_spec=pltpu.PrefetchScalarGridSpec(
                num_scalar_prefetch=0,
                grid=grid,
                in_specs=[
                    # x tile: independent of j -> fetched once per batch tile.
                    pl.BlockSpec((tm, n_in_p), lambda i, j: (i, 0)),
                    # U_k*S: constant block, VMEM-resident for the whole run.
                    pl.BlockSpec((n_in_p, k_p), lambda i, j: (0, 0)),
                    # V_k^T column tile.
                    pl.BlockSpec((k_p, tn), lambda i, j: (0, j)),
                    # bias tile.
                    pl.BlockSpec((1, tn), lambda i, j: (0, j)),
                ],
                out_specs=pl.BlockSpec((tm, tn), lambda i, j: (i, j)),
                scratch_shapes=[pltpu.VMEM((tm, k_p), jnp.bfloat16)],
            ),
            compiler_params=pltpu.CompilerParams(
                # j carries the t-scratch dependency -> "arbitrary";
                # i (batch) is megacore-shardable.
                dimension_semantics=("parallel", "arbitrary"),
                vmem_limit_bytes=_vmem_limit(tiled_need)),
        )(x_in, us_p, vkt_p, b_p)

    return y_p[:B, :n_out]


# ------------------------- pure-JAX references ----------------------------- #
def svd_linear_ref_bf16(x, u_k, s, v_kt, bias):
    """Same math / dtypes as the kernel (bf16 operands, f32 accumulation)."""
    us = (u_k * s.reshape(1, -1)).astype(jnp.bfloat16)
    t = jnp.dot(x.astype(jnp.bfloat16), us, preferred_element_type=jnp.float32)
    y = jnp.dot(t.astype(jnp.bfloat16), v_kt.astype(jnp.bfloat16),
                preferred_element_type=jnp.float32)
    return y + bias


def svd_linear_ref_f32(x, u_k, s, v_kt, bias):
    return ((x @ u_k) * s.reshape(1, -1)) @ v_kt + bias


# --------------------------- parameter setup (glue) ------------------------ #
def skew_from_angles(theta, n):
    """n x n skew-symmetric matrix whose strict upper triangle is theta."""
    a = jnp.zeros((n, n), jnp.float32)
    iu, ju = jnp.triu_indices(n, k=1)
    a = a.at[iu, ju].set(theta)
    return a - a.T


def make_params(key, in_features, out_features):
    k_u, k_v = jax.random.split(key)
    n_u = in_features * (in_features - 1) // 2
    n_v = out_features * (out_features - 1) // 2
    # matches init.uniform_(-pi/2, pi/2)
    u_theta = jax.random.uniform(k_u, (n_u,), jnp.float32,
                                 minval=-math.pi / 2, maxval=math.pi / 2)
    v_theta = jax.random.uniform(k_v, (n_v,), jnp.float32,
                                 minval=-math.pi / 2, maxval=math.pi / 2)
    kmin = min(in_features, out_features)
    s = jnp.ones((kmin,), jnp.float32)                 # init.ones_
    bias = jnp.zeros((1, out_features), jnp.float32)   # init.zeros_

    # TODO(synk): the expm(skew) construction of U / V (matrix exponential)
    # has no clean Pallas equivalent; done in plain JAX once per weight update.
    u_mat = jax.scipy.linalg.expm(skew_from_angles(u_theta, in_features))
    v_mat = jax.scipy.linalg.expm(skew_from_angles(v_theta, out_features))

    u_k = u_mat[:, :kmin]        # (n_in, k)
    v_kt = v_mat[:, :kmin].T     # (k, n_out)
    return u_k, s, v_kt, bias


# --------------------------------- main ------------------------------------ #
if __name__ == "__main__":
    key = jax.random.PRNGKey(0)
    k_x, k_p, k_x2, k_u2, k_v2 = jax.random.split(key, 5)

    # ---- case 1: module's toy config, full expm(skew) parameterization ----
    batch, in_features, out_features = 8, 32, 16
    x = jax.random.normal(k_x, (batch, in_features), jnp.float32)
    u_k, s, v_kt, bias = make_params(k_p, in_features, out_features)
    w = prepare_svd_linear_weights(u_k, s, v_kt, bias)   # once per weight update

    y = jax.block_until_ready(svd_linear_pallas(x, w))
    y_ref = svd_linear_ref_bf16(x, u_k, s, v_kt, bias)
    y_f32 = svd_linear_ref_f32(x, u_k, s, v_kt, bias)
    assert y.shape == (batch, out_features)
    assert jnp.allclose(y, y_ref, atol=1e-4, rtol=1e-4)   # exact-dtype match
    assert jnp.allclose(y, y_f32, atol=1e-1, rtol=1e-1)   # gross-semantics check

    # ---- case 2: multi-tile shapes; exercise BOTH code paths ----
    B2, nin2, nout2 = 300, 96, 200
    kk = min(nin2, nout2)
    x2 = jax.random.normal(k_x2, (B2, nin2), jnp.float32)
    u2 = jax.random.normal(k_u2, (nin2, kk), jnp.float32) / jnp.sqrt(nin2)
    v2t = jax.random.normal(k_v2, (kk, nout2), jnp.float32) / jnp.sqrt(kk)
    s2 = jnp.linspace(0.5, 1.5, kk, dtype=jnp.float32)
    b2 = jnp.zeros((1, nout2), jnp.float32)
    w2 = prepare_svd_linear_weights(u2, s2, v2t, b2)
    y2_ref = svd_linear_ref_bf16(x2, u2, s2, v2t, b2)

    y2_res = jax.block_until_ready(svd_linear_pallas(x2, w2, mode="resident"))
    y2_til = jax.block_until_ready(svd_linear_pallas(x2, w2, mode="tiled"))
    assert y2_res.shape == (B2, nout2) and y2_til.shape == (B2, nout2)
    assert jnp.allclose(y2_res, y2_ref, atol=1e-3, rtol=1e-3)
    assert jnp.allclose(y2_til, y2_ref, atol=1e-3, rtol=1e-3)

    print("KERNEL_OK")
</pallas_src>

<mosaic_0001>
module attributes {stable_mosaic.version = 11 : i64} {
  func.func @_svd_linear_resident_kernel(%arg0: i32, %arg1: memref<8x128xbf16, #tpu.memory_space<vmem>>, %arg2: memref<128x128xbf16, #tpu.memory_space<vmem>>, %arg3: memref<128x128xbf16, #tpu.memory_space<vmem>>, %arg4: memref<1x128xf32, #tpu.memory_space<vmem>>, %arg5: memref<8x128xf32, #tpu.memory_space<vmem>>) attributes {dimension_semantics = [#tpu.dimension_semantics<parallel>], iteration_bounds = array<i64: 1>, scalar_prefetch = 0 : i64, scratch_operands = 0 : i64, tpu.core_type = #tpu.core_type<tc>, window_params = [{transform_indices = @transform_0, window_bounds = array<i64: 8, 128>}, {pipeline_mode = #tpu.pipeline_mode<synchronous>, transform_indices = @transform_1, window_bounds = array<i64: 128, 128>}, {pipeline_mode = #tpu.pipeline_mode<synchronous>, transform_indices = @transform_2, window_bounds = array<i64: 128, 128>}, {pipeline_mode = #tpu.pipeline_mode<synchronous>, transform_indices = @transform_3, window_bounds = array<i64: 1, 128>}, {transform_indices = @transform_4, window_bounds = array<i64: 8, 128>}]} {
    %c0 = arith.constant 0 : index
    %c0_0 = arith.constant 0 : index
    %0 = vector.load %arg1[%c0, %c0_0] : memref<8x128xbf16, #tpu.memory_space<vmem>>, vector<8x128xbf16>
    %c0_1 = arith.constant 0 : index
    %c0_2 = arith.constant 0 : index
    %1 = vector.load %arg2[%c0_1, %c0_2] : memref<128x128xbf16, #tpu.memory_space<vmem>>, vector<128x128xbf16>
    %cst = arith.constant dense<0.000000e+00> : vector<8x128xf32>
    %2 = tpu.matmul %0, %1, %cst {dimension_numbers = #tpu.dot_dimension_numbers<[1], [0], [0], [1], [0, 0, 1, 1], [], []>} : vector<8x128xbf16>, vector<128x128xbf16>, vector<8x128xf32> -> vector<8x128xf32>
    %3 = arith.truncf %2 : vector<8x128xf32> to vector<8x128xbf16>
    %c0_3 = arith.constant 0 : index
    %c0_4 = arith.constant 0 : index
    %4 = vector.load %arg3[%c0_3, %c0_4] : memref<128x128xbf16, #tpu.memory_space<vmem>>, vector<128x128xbf16>
    %cst_5 = arith.constant dense<0.000000e+00> : vector<8x128xf32>
    %5 = tpu.matmul %3, %4, %cst_5 {dimension_numbers = #tpu.dot_dimension_numbers<[1], [0], [0], [1], [0, 0, 1, 1], [], []>} : vector<8x128xbf16>, vector<128x128xbf16>, vector<8x128xf32> -> vector<8x128xf32>
    %c0_6 = arith.constant 0 : index
    %c0_7 = arith.constant 0 : index
    %6 = vector.load %arg4[%c0_6, %c0_7] : memref<1x128xf32, #tpu.memory_space<vmem>>, vector<1x128xf32>
    %7 = vector.broadcast %6 : vector<1x128xf32> to vector<8x128xf32>
    %8 = arith.addf %5, %7 : vector<8x128xf32>
    %c0_8 = arith.constant 0 : index
    %c0_9 = arith.constant 0 : index
    %9 = vector.load %arg5[%c0_8, %c0_9] : memref<8x128xf32, #tpu.memory_space<vmem>>, vector<8x128xf32>
    tpu.vector_store %arg5[%c0_8, %c0_9], %8 {strides = array<i32>} : memref<8x128xf32, #tpu.memory_space<vmem>>, vector<8x128xf32>,
    return
  }
  func.func @transform_0(%arg0: i32) -> (i32, i32) {
    %c0_i32 = arith.constant 0 : i32
    %c0_i32_0 = arith.constant 0 : i32
    return %arg0, %c0_i32 : i32, i32
  }
  func.func @transform_1(%arg0: i32) -> (i32, i32) {
    %c0_i32 = arith.constant 0 : i32
    %c0_i32_0 = arith.constant 0 : i32
    %c0_i32_1 = arith.constant 0 : i32
    return %c0_i32, %c0_i32_0 : i32, i32
  }
  func.func @transform_2(%arg0: i32) -> (i32, i32) {
    %c0_i32 = arith.constant 0 : i32
    %c0_i32_0 = arith.constant 0 : i32
    %c0_i32_1 = arith.constant 0 : i32
    return %c0_i32, %c0_i32_0 : i32, i32
  }
  func.func @transform_3(%arg0: i32) -> (i32, i32) {
    %c0_i32 = arith.constant 0 : i32
    %c0_i32_0 = arith.constant 0 : i32
    %c0_i32_1 = arith.constant 0 : i32
    return %c0_i32, %c0_i32_0 : i32, i32
  }
  func.func @transform_4(%arg0: i32) -> (i32, i32) {
    %c0_i32 = arith.constant 0 : i32
    %c0_i32_0 = arith.constant 0 : i32
    return %arg0, %c0_i32 : i32, i32
  }
}

</mosaic_0001>

<bundles_post_ra>
// kernel: tpu_custom_call.1
= control target key start
LH: loop header
LB: loop body
LE: loop exit
PB: predicated region body
PF: predicated region fallthrough
CT: control target
= control target key end

     0   :  { %9 = vsyncpa [#allocation3], 0  ;;  %s477_s0 = inlined_call_operand.hbm [shape: bf16[8,128], index: 0, kind: input, shape index: {}]   ;;  %s478_s1 = inlined_call_operand.hbm [shape: bf16[128,128], index: 1, kind: input, shape index: {}]   ;;  %s479_s2 = inlined_call_operand.hbm [shape: bf16[128,128], index: 2, kind: input, shape index: {}]   ;;  %s480_s3 = inlined_call_operand.vmem [shape: f32[1,128], index: 3, kind: input, shape index: {}]   ;;  %s481_s4 = inlined_call_operand.hbm [shape: f32[8,128], index: 4, kind: output, shape index: {}]  }
   0x1   :  { %10 = vsyncpa [#allocation6], 0  ;;  %s27_s17 = sshll.u32 %s478_s1, 4  ;;  %s28_s17 = int_to_ptr.hbm [resolvable:$true] %s27_s17 }
   0x2   :  { %11 = vsyncpa [#allocation4], 0  ;;  %s431_s18 = smov [#allocation5]   ;;  %s17_s22 = sshll.u32 %s477_s0, 4  ;;  %s18_s22 = int_to_ptr.hbm [resolvable:$true] %s17_s22 }
   0x3   :  { %s29_s19 = sshll.u32 %s431_s18, 4  ;;  %s432_s23 = smov 64   ;;  %s30_s19 = int_to_ptr.vmem [resolvable:$true] %s29_s19 }
   0x4   :  { %s433_s24 = smov 4   ;;  %s434_s25 = smov [#allocation2]  }
   0x5   :  { %35 = dma.hbm_to_vmem [thread:$0]  %s28_s17, 1024, %s30_s19, [#allocation6], %s432_s23, %s432_s23, %s433_s24  }
   0x6   :  { %s19_s26 = sshll.u32 %s434_s25, 4  ;;  %s40_s29 = sshll.u32 %s479_s2, 4  ;;  %s20_s26 = int_to_ptr.vmem [resolvable:$true] %s19_s26  ;;  %s41_s29 = int_to_ptr.hbm [resolvable:$true] %s40_s29 }
   0x7   :  { %22 = dma.hbm_to_vmem [thread:$0]  %s18_s22, 64, %s20_s26, [#allocation3]  }
   0x8   :  { %s435_s1 = smov [#allocation7]  }
   0x9   :  { %s42_s30 = sshll.u32 %s435_s1, 4  ;;  %s43_s30 = int_to_ptr.vmem [resolvable:$true] %s42_s30 }
   0xa   :  { %48 = dma.hbm_to_vmem [thread:$0]  %s41_s29, 1024, %s43_s30, [#allocation6], %s432_s23, %s432_s23, %s433_s24  }
   0xb   :  { %425 = dma.done.wait [#allocation3], 64  }
   0xc   :  { %426 = vsyncadd [#allocation3], 4294967232 }
   0xd   :  { %427 = dma.done.wait [#allocation6], 2048  }
   0xe   :  { %428 = vsyncadd [#allocation6], 4294965248  ;;  %v313_v0 = vld [vmem:[#allocation5 + $0x38] sm:$0xff]  ;;  %v312_v1 = vld [vmem:[#allocation5 + $0x30] sm:$0xff]  ;;  %s436_s5 = smov [#allocation8]   ;;  %s231_s9 = sshll.u32 %s481_s4, 4  ;;  %s232_s9 = int_to_ptr.hbm [resolvable:$true] %s231_s9 }
   0xf   :  { %128 = vmatpush.bf16.msra.mxu0 %v313_v0  ;;  %v321_v2 = vld [vmem:[#allocation7 + $0x38] sm:$0xff]  ;;  %v320_v3 = vld [vmem:[#allocation7 + $0x30] sm:$0xff]  ;;  %v311_v4 = vld [vmem:[#allocation5 + $0x28] sm:$0xff]  ;;  %s229_s6 = sshll.u32 %s436_s5, 4  ;;  %s230_s6 = int_to_ptr.vmem [resolvable:$true] %s229_s6 }
  0x10   :  { %210 = vmatpush.bf16.msra.mxu1 %v321_v2  ;;  %v319_v5 = vld [vmem:[#allocation7 + $0x28] sm:$0xff]  ;;  %v310_v6 = vld [vmem:[#allocation5 + $0x20] sm:$0xff]  ;;  %v309_v8 = vld [vmem:[#allocation5 + $0x18] sm:$0xff] }
  0x11   :  { %v318_v7 = vld [vmem:[#allocation7 + $0x20] sm:$0xff]  ;;  %v317_v9 = vld [vmem:[#allocation7 + $0x18] sm:$0xff]  ;;  %v308_v10 = vld [vmem:[#allocation5 + $0x10] sm:$0xff] }
  0x12   :  { %v316_v11 = vld [vmem:[#allocation7 + $0x10] sm:$0xff]  ;;  %v307_v12 = vld [vmem:[#allocation5 + $0x8] sm:$0xff]  ;;  %v306_v14 = vld [vmem:[#allocation5] sm:$0xff] }
  0x13   :  { %129 = vmatpush.bf16.msra.mxu0 %v312_v1  ;;  %v315_v13 = vld [vmem:[#allocation7 + $0x8] sm:$0xff]  ;;  %v63_v15 = vld [vmem:[#allocation2] sm:$0xf]  ;;  %v314_v16 = vld [vmem:[#allocation7] sm:$0xff] }
  0x14   :  { %211 = vmatpush.bf16.msra.mxu1 %v320_v3  ;;  %v328_v20 = vld [vmem:[%s480_s3] ss:$0 sm:$0xff] }
  0x17   :  { %130 = vmatpush.bf16.msra.mxu0 %v311_v4 }
  0x18   :  { %212 = vmatpush.bf16.msra.mxu1 %v319_v5 }
  0x1b   :  { %131 = vmatpush.bf16.msra.mxu0 %v310_v6 }
  0x1c   :  { %213 = vmatpush.bf16.msra.mxu1 %v318_v7 }
  0x1f   :  { %132 = vmatpush.bf16.msra.mxu0 %v309_v8 }
  0x20   :  { %214 = vmatpush.bf16.msra.mxu1 %v317_v9 }
  0x23   :  { %133 = vmatpush.bf16.msra.mxu0 %v308_v10 }
  0x24   :  { %215 = vmatpush.bf16.msra.mxu1 %v316_v11 }
  0x27   :  { %134 = vmatpush.bf16.msra.mxu0 %v307_v12 }
  0x28   :  { %216 = vmatpush.bf16.msra.mxu1 %v315_v13 }
  0x2b   :  { %135 = vmatpush.bf16.msra.mxu0 %v306_v14 }
  0x2c   :  { %217 = vmatpush.bf16.msra.mxu1 %v314_v16 }
  0x2e   :  { %136 = vmatmul.bf16.vlgmr.msra.gmra.mxu0 %v63_v15 }
  0xab   :  { %v137_v17 = vpop.f32.mrf.mxu0 }
  0xac   :  { %v141_v18 = vpack.c.bf16 %v137_v17, %v137_v17 }
  0xae   :  { %218 = vmatmul.bf16.vlgmr.msra.gmra.mxu1 %v141_v18 }
  0xb3   :  { %v139_v19 = vpop.f32.mrf.mxu0 }
 0x12b   :  { %v219_v21 = vpop.f32.mrf.mxu1 }
 0x12c   :  { %v220_v22 = vadd.f32 %v328_v20, %v219_v21 }
 0x12e   :  { %223 = vst [vmem:[#allocation8] sm:$0xff] %v220_v22 }
 0x12f   :  { %234 = dma.vmem_to_hbm [thread:$0]  %s230_s6, 128, %s232_s9, [#allocation4]  }
 0x133   :  { %v221_v23 = vpop.f32.mrf.mxu1 }
 0x134   :  { %429 = dma.done.wait [#allocation4], 128  }
 0x135   :  { %430 = vsyncadd [#allocation4], 4294967168 }
 0x136   :  { %239 = vsyncpa [#allocation3], 1 }
 0x137   :  { %240 = vsyncpa [#allocation6], 1 }
 0x138   :  { %241 = vsyncpa [#allocation4], 1 }

</bundles_post_ra>
